<compile_context>
chip_gen: v5e
topology: v5e:2x2
jax: 0.10.0
libtpu: 0.0.40
codegen_flags: <defaults>
</compile_context>

<pallas_src>
import jax
import jax.numpy as jnp
from jax.experimental import pallas as pl
from jax.experimental.pallas import tpu as pltpu


def _round_up(x, m):
    return ((x + m - 1) // m) * m


def decoder_kernel(z_ref, lab_ref, w1z_ref, w1l_ref, b1_ref,
                   w2_ref, b2_ref, w3_ref, b3_ref, o_ref):
    # First layer: concat(z, label) @ W1 is computed as a split matmul so the
    # wrapper never materializes the concatenated input in HBM.
    h1 = (jnp.dot(z_ref[...], w1z_ref[...], preferred_element_type=jnp.float32)
          + jnp.dot(lab_ref[...], w1l_ref[...], preferred_element_type=jnp.float32)
          + b1_ref[...])
    h1 = jnp.maximum(h1, 0.0)

    h2 = jnp.dot(h1, w2_ref[...], preferred_element_type=jnp.float32) + b2_ref[...]
    h2 = jnp.maximum(h2, 0.0)

    # TODO(synk): nn.Dropout(0.2) is identity in eval mode; training-mode
    # dropout (pltpu.prng_random_bits mask) intentionally not applied here.

    logits = jnp.dot(h2, w3_ref[...], preferred_element_type=jnp.float32) + b3_ref[...]
    # sigmoid lowers to EUP exp + reciprocal -> free filler behind the MXU.
    o_ref[...] = jax.nn.sigmoid(logits).astype(o_ref.dtype)


def decoder_forward(z, label, params, *, block_m=512):
    """Batch-tiled fused decoder forward.

    z:      (B, z_dim) f32
    label:  (B, label_dim) f32
    params: (w1, b1, w2, b2, w3, b3) with w* in (in, out) layout, b* in (1, out).
    """
    w1, b1, w2, b2, w3, b3 = params
    B, z_dim = z.shape
    label_dim = label.shape[1]
    hidden = w1.shape[1]
    inp_size = w3.shape[1]

    # --- Fold the concat into the first matmul: split W1 (tiny, one-time op).
    w1z = w1[:z_dim]
    w1l = w1[z_dim:]

    # --- Lane-dense output: pad the last Linear's output dim to a multiple of
    #     128 so the output store is an unmasked vst; slice the padding away
    #     in the wrapper.  (Padded columns compute sigmoid(0)=0.5, discarded.)
    LANE = 128
    n_pad = _round_up(inp_size, LANE)
    if n_pad != inp_size:
        w3 = jnp.pad(w3, ((0, 0), (0, n_pad - inp_size)))
        b3 = jnp.pad(b3, ((0, 0), (0, n_pad - inp_size)))

    # --- Batch tiling.  tm is a multiple of 8 (sublane); clamp to the batch.
    #     At these feature widths a 512-row tile is <2 MiB double-buffered, far
    #     under the v7x 32 MiB default scoped VMEM, so no vmem_limit override.
    tm = min(block_m, _round_up(B, 8))
    b_pad = _round_up(B, tm)
    if b_pad != B:
        # Pad the final partial tile so no garbage rows are produced.
        z = jnp.pad(z, ((0, b_pad - B), (0, 0)))
        label = jnp.pad(label, ((0, b_pad - B), (0, 0)))

    grid = (pl.cdiv(b_pad, tm),)

    def full_spec(shape):
        # Whole-array VMEM resident (same block for every grid step).
        return pl.BlockSpec(shape, lambda i: (0, 0))

    out = pl.pallas_call(
        decoder_kernel,
        out_shape=jax.ShapeDtypeStruct((b_pad, n_pad), jnp.float32),
        grid=grid,
        in_specs=[
            pl.BlockSpec((tm, z_dim), lambda i: (i, 0)),       # z tile
            pl.BlockSpec((tm, label_dim), lambda i: (i, 0)),   # label tile
            full_spec(w1z.shape),
            full_spec(w1l.shape),
            full_spec(b1.shape),
            full_spec(w2.shape),
            full_spec(b2.shape),
            full_spec(w3.shape),
            full_spec(b3.shape),
        ],
        out_specs=pl.BlockSpec((tm, n_pad), lambda i: (i, 0)),
        compiler_params=pltpu.CompilerParams(
            # Batch tiles are independent -> shard across v7x's 2 TensorCores.
            dimension_semantics=("parallel",),
        ),
    )(z, label, w1z, w1l, b1, w2, b2, w3, b3)

    return out[:B, :inp_size]


def init_params(key, latent_size, hidden_size, inp_size):
    """Deterministic init mimicking nn.Linear's U(-1/sqrt(fan_in), 1/sqrt(fan_in))."""
    ks = jax.random.split(key, 6)

    def linear(kw, kb, fan_in, fan_out):
        bound = 1.0 / jnp.sqrt(fan_in)
        w = jax.random.uniform(kw, (fan_in, fan_out), jnp.float32, -bound, bound)
        b = jax.random.uniform(kb, (1, fan_out), jnp.float32, -bound, bound)
        return w, b

    w1, b1 = linear(ks[0], ks[1], latent_size, hidden_size)
    w2, b2 = linear(ks[2], ks[3], hidden_size, hidden_size)
    w3, b3 = linear(ks[4], ks[5], hidden_size, inp_size)
    return (w1, b1, w2, b2, w3, b3)


def _reference(z, label, params):
    w1, b1, w2, b2, w3, b3 = params
    inp = jnp.concatenate((z, label), axis=-1)
    h1 = jnp.maximum(inp @ w1 + b1, 0.0)
    h2 = jnp.maximum(h1 @ w2 + b2, 0.0)
    return jax.nn.sigmoid(h2 @ w3 + b3)


if __name__ == "__main__":
    # Small shapes consistent with the module:
    #   z: (batch, z_dim), label: (batch, label_dim),
    #   latent_size = z_dim + label_dim (input to the first Linear).
    batch, z_dim, label_dim = 8, 8, 8
    latent_size = z_dim + label_dim      # 16
    hidden_size = 32
    inp_size = 16

    key = jax.random.PRNGKey(0)
    kz, klabel, kparams = jax.random.split(key, 3)

    z = jax.random.normal(kz, (batch, z_dim), dtype=jnp.float32)
    label = jax.random.normal(klabel, (batch, label_dim), dtype=jnp.float32)
    params = init_params(kparams, latent_size, hidden_size, inp_size)

    out = decoder_forward(z, label, params)
    jax.block_until_ready(out)

    ref = _reference(z, label, params)
    assert out.shape == (batch, inp_size)
    assert jnp.allclose(out, ref, atol=1e-5, rtol=1e-5)

    # Also exercise the ragged-batch path (batch not a multiple of the tile /
    # sublane) to confirm the padding + slicing logic writes no garbage rows.
    z2, label2 = z[:5], label[:5]
    out2 = decoder_forward(z2, label2, params)
    jax.block_until_ready(out2)
    assert out2.shape == (5, inp_size)
    assert jnp.allclose(out2, _reference(z2, label2, params), atol=1e-5, rtol=1e-5)

    print("KERNEL_OK")
</pallas_src>

<mosaic_0001>
module attributes {stable_mosaic.version = 11 : i64} {
  func.func @decoder_kernel(%arg0: i32, %arg1: memref<8x8xf32, #tpu.memory_space<vmem>>, %arg2: memref<8x8xf32, #tpu.memory_space<vmem>>, %arg3: memref<8x32xf32, #tpu.memory_space<vmem>>, %arg4: memref<8x32xf32, #tpu.memory_space<vmem>>, %arg5: memref<1x32xf32, #tpu.memory_space<vmem>>, %arg6: memref<32x32xf32, #tpu.memory_space<vmem>>, %arg7: memref<1x32xf32, #tpu.memory_space<vmem>>, %arg8: memref<32x128xf32, #tpu.memory_space<vmem>>, %arg9: memref<1x128xf32, #tpu.memory_space<vmem>>, %arg10: memref<8x128xf32, #tpu.memory_space<vmem>>) attributes {dimension_semantics = [#tpu.dimension_semantics<parallel>], iteration_bounds = array<i64: 1>, scalar_prefetch = 0 : i64, scratch_operands = 0 : i64, tpu.core_type = #tpu.core_type<tc>, window_params = [{transform_indices = @transform_0, window_bounds = array<i64: 8, 8>}, {transform_indices = @transform_1, window_bounds = array<i64: 8, 8>}, {pipeline_mode = #tpu.pipeline_mode<synchronous>, transform_indices = @transform_2, window_bounds = array<i64: 8, 32>}, {pipeline_mode = #tpu.pipeline_mode<synchronous>, transform_indices = @transform_3, window_bounds = array<i64: 8, 32>}, {pipeline_mode = #tpu.pipeline_mode<synchronous>, transform_indices = @transform_4, window_bounds = array<i64: 1, 32>}, {pipeline_mode = #tpu.pipeline_mode<synchronous>, transform_indices = @transform_5, window_bounds = array<i64: 32, 32>}, {pipeline_mode = #tpu.pipeline_mode<synchronous>, transform_indices = @transform_6, window_bounds = array<i64: 1, 32>}, {pipeline_mode = #tpu.pipeline_mode<synchronous>, transform_indices = @transform_7, window_bounds = array<i64: 32, 128>}, {pipeline_mode = #tpu.pipeline_mode<synchronous>, transform_indices = @transform_8, window_bounds = array<i64: 1, 128>}, {transform_indices = @transform_9, window_bounds = array<i64: 8, 128>}]} {
    %c0 = arith.constant 0 : index
    %c0_0 = arith.constant 0 : index
    %0 = vector.load %arg1[%c0, %c0_0] : memref<8x8xf32, #tpu.memory_space<vmem>>, vector<8x8xf32>
    %c0_1 = arith.constant 0 : index
    %c0_2 = arith.constant 0 : index
    %1 = vector.load %arg3[%c0_1, %c0_2] : memref<8x32xf32, #tpu.memory_space<vmem>>, vector<8x32xf32>
    %cst = arith.constant dense<0.000000e+00> : vector<8x32xf32>
    %2 = tpu.matmul %0, %1, %cst {dimension_numbers = #tpu.dot_dimension_numbers<[1], [0], [0], [1], [0, 0, 1, 1], [], []>} : vector<8x8xf32>, vector<8x32xf32>, vector<8x32xf32> -> vector<8x32xf32>
    %c0_3 = arith.constant 0 : index
    %c0_4 = arith.constant 0 : index
    %3 = vector.load %arg2[%c0_3, %c0_4] : memref<8x8xf32, #tpu.memory_space<vmem>>, vector<8x8xf32>
    %c0_5 = arith.constant 0 : index
    %c0_6 = arith.constant 0 : index
    %4 = vector.load %arg4[%c0_5, %c0_6] : memref<8x32xf32, #tpu.memory_space<vmem>>, vector<8x32xf32>
    %cst_7 = arith.constant dense<0.000000e+00> : vector<8x32xf32>
    %5 = tpu.matmul %3, %4, %cst_7 {dimension_numbers = #tpu.dot_dimension_numbers<[1], [0], [0], [1], [0, 0, 1, 1], [], []>} : vector<8x8xf32>, vector<8x32xf32>, vector<8x32xf32> -> vector<8x32xf32>
    %6 = arith.addf %2, %5 : vector<8x32xf32>
    %c0_8 = arith.constant 0 : index
    %c0_9 = arith.constant 0 : index
    %7 = vector.load %arg5[%c0_8, %c0_9] : memref<1x32xf32, #tpu.memory_space<vmem>>, vector<1x32xf32>
    %8 = vector.broadcast %7 : vector<1x32xf32> to vector<8x32xf32>
    %9 = arith.addf %6, %8 : vector<8x32xf32>
    %cst_10 = arith.constant 0.000000e+00 : f32
    %10 = vector.broadcast %cst_10 : f32 to vector<8x32xf32>
    %11 = arith.maximumf %9, %10 : vector<8x32xf32>
    %c0_11 = arith.constant 0 : index
    %c0_12 = arith.constant 0 : index
    %12 = vector.load %arg6[%c0_11, %c0_12] : memref<32x32xf32, #tpu.memory_space<vmem>>, vector<32x32xf32>
    %cst_13 = arith.constant dense<0.000000e+00> : vector<8x32xf32>
    %13 = tpu.matmul %11, %12, %cst_13 {dimension_numbers = #tpu.dot_dimension_numbers<[1], [0], [0], [1], [0, 0, 1, 1], [], []>} : vector<8x32xf32>, vector<32x32xf32>, vector<8x32xf32> -> vector<8x32xf32>
    %c0_14 = arith.constant 0 : index
    %c0_15 = arith.constant 0 : index
    %14 = vector.load %arg7[%c0_14, %c0_15] : memref<1x32xf32, #tpu.memory_space<vmem>>, vector<1x32xf32>
    %15 = vector.broadcast %14 : vector<1x32xf32> to vector<8x32xf32>
    %16 = arith.addf %13, %15 : vector<8x32xf32>
    %cst_16 = arith.constant 0.000000e+00 : f32
    %17 = vector.broadcast %cst_16 : f32 to vector<8x32xf32>
    %18 = arith.maximumf %16, %17 : vector<8x32xf32>
    %c0_17 = arith.constant 0 : index
    %c0_18 = arith.constant 0 : index
    %19 = vector.load %arg8[%c0_17, %c0_18] : memref<32x128xf32, #tpu.memory_space<vmem>>, vector<32x128xf32>
    %cst_19 = arith.constant dense<0.000000e+00> : vector<8x128xf32>
    %20 = tpu.matmul %18, %19, %cst_19 {dimension_numbers = #tpu.dot_dimension_numbers<[1], [0], [0], [1], [0, 0, 1, 1], [], []>} : vector<8x32xf32>, vector<32x128xf32>, vector<8x128xf32> -> vector<8x128xf32>
    %c0_20 = arith.constant 0 : index
    %c0_21 = arith.constant 0 : index
    %21 = vector.load %arg9[%c0_20, %c0_21] : memref<1x128xf32, #tpu.memory_space<vmem>>, vector<1x128xf32>
    %22 = vector.broadcast %21 : vector<1x128xf32> to vector<8x128xf32>
    %23 = arith.addf %20, %22 : vector<8x128xf32>
    %24 = arith.negf %23 : vector<8x128xf32>
    %25 = math.exp %24 : vector<8x128xf32>
    %cst_22 = arith.constant 1.000000e+00 : f32
    %26 = vector.broadcast %cst_22 : f32 to vector<8x128xf32>
    %27 = arith.addf %26, %25 : vector<8x128xf32>
    %28 = arith.divf %26, %27 : vector<8x128xf32>
    %c0_23 = arith.constant 0 : index
    %c0_24 = arith.constant 0 : index
    %29 = vector.load %arg10[%c0_23, %c0_24] : memref<8x128xf32, #tpu.memory_space<vmem>>, vector<8x128xf32>
    tpu.vector_store %arg10[%c0_23, %c0_24], %28 {strides = array<i32>} : memref<8x128xf32, #tpu.memory_space<vmem>>, vector<8x128xf32>,
    return
  }
  func.func @transform_0(%arg0: i32) -> (i32, i32) {
    %c0_i32 = arith.constant 0 : i32
    %c0_i32_0 = arith.constant 0 : i32
    return %arg0, %c0_i32 : i32, i32
  }
  func.func @transform_1(%arg0: i32) -> (i32, i32) {
    %c0_i32 = arith.constant 0 : i32
    %c0_i32_0 = arith.constant 0 : i32
    return %arg0, %c0_i32 : i32, i32
  }
  func.func @transform_2(%arg0: i32) -> (i32, i32) {
    %c0_i32 = arith.constant 0 : i32
    %c0_i32_0 = arith.constant 0 : i32
    %c0_i32_1 = arith.constant 0 : i32
    return %c0_i32, %c0_i32_0 : i32, i32
  }
  func.func @transform_3(%arg0: i32) -> (i32, i32) {
    %c0_i32 = arith.constant 0 : i32
    %c0_i32_0 = arith.constant 0 : i32
    %c0_i32_1 = arith.constant 0 : i32
    return %c0_i32, %c0_i32_0 : i32, i32
  }
  func.func @transform_4(%arg0: i32) -> (i32, i32) {
    %c0_i32 = arith.constant 0 : i32
    %c0_i32_0 = arith.constant 0 : i32
    %c0_i32_1 = arith.constant 0 : i32
    return %c0_i32, %c0_i32_0 : i32, i32
  }
  func.func @transform_5(%arg0: i32) -> (i32, i32) {
    %c0_i32 = arith.constant 0 : i32
    %c0_i32_0 = arith.constant 0 : i32
    %c0_i32_1 = arith.constant 0 : i32
    return %c0_i32, %c0_i32_0 : i32, i32
  }
  func.func @transform_6(%arg0: i32) -> (i32, i32) {
    %c0_i32 = arith.constant 0 : i32
    %c0_i32_0 = arith.constant 0 : i32
    %c0_i32_1 = arith.constant 0 : i32
    return %c0_i32, %c0_i32_0 : i32, i32
  }
  func.func @transform_7(%arg0: i32) -> (i32, i32) {
    %c0_i32 = arith.constant 0 : i32
    %c0_i32_0 = arith.constant 0 : i32
    %c0_i32_1 = arith.constant 0 : i32
    return %c0_i32, %c0_i32_0 : i32, i32
  }
  func.func @transform_8(%arg0: i32) -> (i32, i32) {
    %c0_i32 = arith.constant 0 : i32
    %c0_i32_0 = arith.constant 0 : i32
    %c0_i32_1 = arith.constant 0 : i32
    return %c0_i32, %c0_i32_0 : i32, i32
  }
  func.func @transform_9(%arg0: i32) -> (i32, i32) {
    %c0_i32 = arith.constant 0 : i32
    %c0_i32_0 = arith.constant 0 : i32
    return %arg0, %c0_i32 : i32, i32
  }
}

</mosaic_0001>

<bundles_post_ra>
// kernel: tpu_custom_call.1
= control target key start
LH: loop header
LB: loop body
LE: loop exit
PB: predicated region body
PF: predicated region fallthrough
CT: control target
= control target key end

     0   :  { %14 = vsyncpa [#allocation3], 0  ;;  %s568_s0 = inlined_call_operand.hbm [shape: f32[8,8], index: 0, kind: input, shape index: {}]   ;;  %s569_s1 = inlined_call_operand.hbm [shape: f32[8,8], index: 1, kind: input, shape index: {}]   ;;  %s570_s2 = inlined_call_operand.hbm [shape: f32[8,32], index: 2, kind: input, shape index: {}]   ;;  %s571_s3 = inlined_call_operand.hbm [shape: f32[8,32], index: 3, kind: input, shape index: {}]   ;;  %s572_s4 = inlined_call_operand.vmem [shape: f32[1,32], index: 4, kind: input, shape index: {}]   ;;  %s573_s5 = inlined_call_operand.hbm [shape: f32[32,32], index: 5, kind: input, shape index: {}]   ;;  %s574_s6 = inlined_call_operand.vmem [shape: f32[1,32], index: 6, kind: input, shape index: {}]   ;;  %s575_s7 = inlined_call_operand.hbm [shape: f32[32,128], index: 7, kind: input, shape index: {}]   ;;  %s576_s8 = inlined_call_operand.vmem [shape: f32[1,128], index: 8, kind: input, shape index: {}]   ;;  %s577_s9 = inlined_call_operand.hbm [shape: f32[8,128], index: 9, kind: output, shape index: {}]  }
   0x1   :  { %15 = vsyncpa [#allocation6], 0 }
   0x2   :  { %16 = vsyncpa [#allocation9], 0 }
   0x3   :  { %17 = vsyncpa [#allocation12], 0  ;;  %s35_s11 = sshll.u32 %s569_s1, 4  ;;  %s36_s11 = int_to_ptr.hbm [resolvable:$true] %s35_s11 }
   0x4   :  { %18 = vsyncpa [#allocation4], 0  ;;  %s479_s12 = smov [#allocation5]   ;;  %s57_s16 = sshll.u32 %s571_s3, 4  ;;  %s58_s16 = int_to_ptr.hbm [resolvable:$true] %s57_s16 }
   0x5   :  { %s37_s13 = sshll.u32 %s479_s12, 4  ;;  %s480_s17 = smov [#allocation8]   ;;  %s38_s13 = int_to_ptr.vmem [resolvable:$true] %s37_s13 }
   0x6   :  { %40 = dma.hbm_to_vmem [thread:$0]  %s36_s11, 128, %s38_s13, [#allocation6]  }
   0x7   :  { %s59_s18 = sshll.u32 %s480_s17, 4  ;;  %s24_s21 = sshll.u32 %s568_s0, 4  ;;  %s60_s18 = int_to_ptr.vmem [resolvable:$true] %s59_s18  ;;  %s25_s21 = int_to_ptr.hbm [resolvable:$true] %s24_s21 }
   0x8   :  { %62 = dma.hbm_to_vmem [thread:$0]  %s58_s16, 128, %s60_s18, [#allocation9]  }
   0x9   :  { %s46_s23 = sshll.u32 %s570_s2, 4  ;;  %s481_s24 = smov [#allocation2]   ;;  %s47_s23 = int_to_ptr.hbm [resolvable:$true] %s46_s23 }
   0xa   :  { %s26_s25 = sshll.u32 %s481_s24, 4  ;;  %s482_s3 = smov [#allocation7]   ;;  %s27_s25 = int_to_ptr.vmem [resolvable:$true] %s26_s25 }
   0xb   :  { %29 = dma.hbm_to_vmem [thread:$0]  %s25_s21, 128, %s27_s25, [#allocation3]  }
   0xc   :  { %s48_s26 = sshll.u32 %s482_s3, 4  ;;  %s69_s29 = sshll.u32 %s573_s5, 4  ;;  %s49_s26 = int_to_ptr.vmem [resolvable:$true] %s48_s26  ;;  %s70_s29 = int_to_ptr.hbm [resolvable:$true] %s69_s29 }
   0xd   :  { %51 = dma.hbm_to_vmem [thread:$0]  %s47_s23, 128, %s49_s26, [#allocation6]  }
   0xe   :  { %s483_s0 = smov [#allocation10]   ;;  %s84_s2 = sshll.u32 %s575_s7, 4  ;;  %s85_s2 = int_to_ptr.hbm [resolvable:$true] %s84_s2 }
   0xf   :  { %s71_s30 = sshll.u32 %s483_s0, 4  ;;  %s484_s12 = smov 128   ;;  %s72_s30 = int_to_ptr.vmem [resolvable:$true] %s71_s30 }
  0x10   :  { %s485_s13 = smov 8   ;;  %s486_s14 = smov [#allocation11]  }
  0x11   :  { %77 = dma.hbm_to_vmem [thread:$0]  %s70_s29, 512, %s72_s30, [#allocation9], %s484_s12, %s484_s12, %s485_s13  }
  0x12   :  { %s86_s15 = sshll.u32 %s486_s14, 4  ;;  %s87_s15 = int_to_ptr.vmem [resolvable:$true] %s86_s15 }
  0x13   :  { %92 = dma.hbm_to_vmem [thread:$0]  %s85_s2, 512, %s87_s15, [#allocation12], %s484_s12, %s484_s12, %s485_s13  }
  0x14   :  { %469 = dma.done.wait [#allocation3], 128  }
  0x15   :  { %470 = vsyncadd [#allocation3], 4294967168 }
  0x16   :  { %471 = dma.done.wait [#allocation6], 256  }
  0x17   :  { %472 = vsyncadd [#allocation6], 4294967040 }
  0x18   :  { %473 = dma.done.wait [#allocation9], 640  }
  0x19   :  { %474 = vsyncadd [#allocation9], 4294966656 }
  0x1a   :  { %475 = dma.done.wait [#allocation12], 512  }
  0x1b   :  { %476 = vsyncadd [#allocation12], 4294966784  ;;  %vm123_vm0 = vcmask 64512   ;;  %v122_v0 = vld [vmem:[#allocation8] sm:$0xff]  ;;  %v120_v1 = vld [vmem:[#allocation7] sm:$0xff]  ;;  %vm184_vm1 = vcmask 261120  }
  0x1c   :  { %v121_v2 = vld [vmem:[#allocation5] sm:$0xff]  ;;  %142 = vmatpush.msra.mxu0 %v122_v0  ;;  %165 = vmatpush.msra.mxu1 %v120_v1  ;;  %v119_v3 = vld [vmem:[#allocation2] sm:$0xff]  ;;  %v179_v4 = vld [vmem:[#allocation10 + $0x18] sm:$0xff] }
  0x1d   :  { %280 = vmatmul.msk.f32.vlgmr.msra.gmra.mxu0 %vm123_vm0, %v121_v2  ;;  %281 = vmatmul.msk.f32.vlgmr.msra.gmra.mxu1 %vm123_vm0, %v119_v3  ;;  %v178_v5 = vld [vmem:[#allocation10 + $0x10] sm:$0xff]  ;;  %v177_v6 = vld [vmem:[#allocation10 + $0x8] sm:$0xff]  ;;  %v176_v7 = vld [vmem:[#allocation10] sm:$0xff] }
  0x1e   :  { %200 = vmatpush.msra.mxu2 %v179_v4  ;;  %v212_v8 = vld [vmem:[#allocation11 + $0x18] sm:$0xff]  ;;  %v294_v9 = vld [vmem:[%s572_s4] ss:$0 sm:$0xff]  ;;  %v211_v15 = vld [vmem:[#allocation11 + $0x10] sm:$0xff] }
  0x1f   :  { %232 = vmatpush.msra.mxu3 %v212_v8  ;;  %v210_v16 = vld [vmem:[#allocation11 + $0x8] sm:$0xff]  ;;  %v209_v17 = vld [vmem:[#allocation11] sm:$0xff] }
  0x20   :  { %201 = vmatpush.msra.mxu2 %v178_v5  ;;  %v295_v18 = vld [vmem:[%s574_s6] ss:$0 sm:$0xff]  ;;  %s487_s6 = smov [#allocation13]  }
  0x21   :  { %233 = vmatpush.msra.mxu3 %v211_v15  ;;  %v296_v22 = vld [vmem:[%s576_s8] ss:$0 sm:$0xff]  ;;  %s265_s19 = sshll.u32 %s487_s6, 4  ;;  %s267_s8 = sshll.u32 %s577_s9, 4  ;;  %s266_s19 = int_to_ptr.vmem [resolvable:$true] %s265_s19  ;;  %s268_s8 = int_to_ptr.hbm [resolvable:$true] %s267_s8 }
  0x22   :  { %202 = vmatpush.msra.mxu2 %v177_v6 }
  0x23   :  { %234 = vmatpush.msra.mxu3 %v210_v16 }
  0x24   :  { %203 = vmatpush.msra.mxu2 %v176_v7 }
  0x25   :  { %235 = vmatpush.msra.mxu3 %v209_v17 }
  0x9a   :  { %v144_v10 = vpop.f32.mrf.mxu0  ;;  %v167_v11 = vpop.f32.mrf.mxu1 }
  0x9b   :  { %v168_v12 = vadd.f32 %v167_v11, %v144_v10 }
  0x9d   :  { %v174_v13 = vadd.f32 %v294_v9, %v168_v12 }
  0x9f   :  { %v175_v14 = vmax.f32 %v174_v13, 0.0 }
  0xa1   :  { %282 = vmatmul.msk.f32.vlgmr.msra.gmra.mxu2 %vm184_vm1, %v175_v14 }
 0x124   :  { %v205_v19 = vpop.f32.mrf.mxu2 }
 0x125   :  { %v206_v20 = vadd.f32 %v295_v18, %v205_v19 }
 0x127   :  { %v208_v21 = vmax.f32 %v206_v20, 0.0 }
 0x129   :  { %283 = vmatmul.msk.f32.vlgmr.msra.gmra.mxu3 %vm184_vm1, %v208_v21 }
 0x1ac   :  { %v237_v23 = vpop.f32.mrf.mxu3 }
 0x1ad   :  { %v238_v24 = vadd.f32 %v296_v22, %v237_v23 }
 0x1af   :  { %v284_v25 = vmul.f32 -1.442695, %v238_v24 }
 0x1b1   :  { %297 = vpow2.f32 %v284_v25 }
 0x1b7   :  { %v298_v26 = vpop.eup %297 }
 0x1b8   :  { %v243_v27 = vadd.f32 1.0, %v298_v26 }
 0x1ba   :  { %299 = vrcp.f32 %v243_v27  ;;  %v255_v31 = vand.u32 2147483648, %v243_v27  ;;  %v253_v33 = vand.u32 2147483647, %v243_v27  ;;  %vm249_vm3 = vweird.f32 %v243_v27 }
 0x1bc   :  { %v256_v35 = vor.u32 1.1754944e-38, %v255_v31  ;;  %vm254_vm5 = vcmp.eq.f32.partialorder %v253_v33, 8.507059e+37 }
 0x1c0   :  { %v300_v28 = vpop.eup %299 }
 0x1c1   :  { %v245_v29 = vmul.f32 %v300_v28, %v243_v27  ;;  %vm250_vm2 = vweird.f32 %v300_v28 }
 0x1c2   :  { %vm251_vm4 = vmor %vm249_vm3, %vm250_vm2 }
 0x1c3   :  { %v246_v30 = vsub.f32 1.0, %v245_v29 }
 0x1c5   :  { %v247_v32 = vmul.f32 %v300_v28, %v246_v30 }
 0x1c7   :  { %v248_v34 = vadd.f32 %v300_v28, %v247_v32 }
 0x1c9   :  { %v252_v36 = vsel %vm251_vm4, %v300_v28, %v248_v34 }
 0x1ca   :  { %v257_v37 = vsel %vm254_vm5, %v256_v35, %v252_v36 }
 0x1cb   :  { %259 = vst [vmem:[#allocation13] sm:$0xff] %v257_v37 }
 0x1cc   :  { %270 = dma.vmem_to_hbm [thread:$0]  %s266_s19, 128, %s268_s8, [#allocation4]  }
 0x1cd   :  { %477 = dma.done.wait [#allocation4], 128  }
 0x1ce   :  { %478 = vsyncadd [#allocation4], 4294967168 }
 0x1cf   :  { %275 = vsyncpa [#allocation3], 1 }
 0x1d0   :  { %276 = vsyncpa [#allocation6], 1 }
 0x1d1   :  { %277 = vsyncpa [#allocation9], 1 }
 0x1d2   :  { %278 = vsyncpa [#allocation12], 1 }
 0x1d3   :  { %279 = vsyncpa [#allocation4], 1 }

</bundles_post_ra>
